<compile_context>
chip_gen: v5e
topology: v5e:2x2
jax: 0.10.0
libtpu: 0.0.40
codegen_flags: <defaults>
</compile_context>

<pallas_src>
import jax
import jax.numpy as jnp
import numpy as np
from jax import lax
from jax.experimental import pallas as pl
from jax.experimental.pallas import tpu as pltpu

MARGIN = 0.2
PAIRWISE_EPS = 1e-6  # matches F.pairwise_distance default eps


def _make_kernel(n_valid, n_pad, tile_m, feat_dim, margin, in_dtype):
    needs_mask = (n_pad != n_valid)
    cast_onehot = jnp.dtype(in_dtype) != jnp.dtype(jnp.float32)

    def kernel(fa_ref, f_ref, o_ref, labc_ref, labr_ref, sum_ref, cnt_ref):
        # ---- anchor tile (native dtype) + f32 copy for VPU/EUP math ----
        fa_raw = fa_ref[...]                                # (TM, D)
        fa32 = fa_raw.astype(jnp.float32)
        lab_col = labc_ref[...]                             # (TM, 1) int32
        lab_row = labr_ref[...]                             # (1, Npad) int32
        o_raw = o_ref[...]                                  # (Npad, D)

        # ---- squared cdist proxy (selection only needs ranking: no sqrt) ----
        fo = lax.dot_general(fa_raw, o_raw, (((1,), (1,)), ((), ())),
                             preferred_element_type=jnp.float32)      # (TM, Npad)
        f2 = jnp.sum(fa32 * fa32, axis=1, keepdims=True)               # (TM, 1)
        osq = jnp.square(o_raw.astype(jnp.float32))                    # (Npad, D)
        o2_row = lax.dot_general(jnp.ones((1, feat_dim), jnp.float32), osq,
                                 (((1,), (1,)), ((), ())),
                                 preferred_element_type=jnp.float32)   # (1, Npad)
        d2 = (f2 - 2.0 * fo) + o2_row                                  # (TM, Npad)

        col_idx = lax.broadcasted_iota(jnp.int32, (tile_m, n_pad), 1)
        same = lab_col == lab_row
        if needs_mask:
            col_ok = col_idx < n_valid
            pos_mask = jnp.logical_and(same, col_ok)
            neg_excl = jnp.logical_or(same, jnp.logical_not(col_ok))
        else:
            pos_mask = same
            neg_excl = same

        def gather(onehot_f32, src_raw):
            oh = onehot_f32.astype(in_dtype) if cast_onehot else onehot_f32
            return jnp.dot(oh, src_raw, preferred_element_type=jnp.float32)

        # ---- positive branch (hardest positive; gathered from `features`) ----
        pos_vals = jnp.where(pos_mask, d2, -jnp.inf)
        pos_max = jnp.max(pos_vals, axis=1, keepdims=True)
        pos_idx = jnp.min(jnp.where(pos_vals == pos_max, col_idx, n_pad),
                          axis=1, keepdims=True)                       # (TM, 1)
        pos_feats = gather((col_idx == pos_idx).astype(jnp.float32), f_ref[...])
        dp = fa32 - pos_feats + PAIRWISE_EPS
        pos_d = jnp.sqrt(jnp.sum(dp * dp, axis=1, keepdims=True))      # (TM, 1)

        # ---- negative branch (hardest negative; gathered from `old_features`) ----
        neg_vals = jnp.where(neg_excl, jnp.inf, d2)
        neg_min = jnp.min(neg_vals, axis=1, keepdims=True)
        neg_idx = jnp.min(jnp.where(neg_vals == neg_min, col_idx, n_pad),
                          axis=1, keepdims=True)                       # (TM, 1)
        neg_feats = gather((col_idx == neg_idx).astype(jnp.float32), o_raw)
        dn = fa32 - neg_feats + PAIRWISE_EPS
        neg_d = jnp.sqrt(jnp.sum(dn * dn, axis=1, keepdims=True))      # (TM, 1)

        # ---- validity from pos_mask only (anchors with no negative skipped) ----
        pos_cnt = jnp.sum(pos_mask.astype(jnp.float32), axis=1, keepdims=True)
        valid = pos_cnt < float(n_valid)                               # (TM, 1)
        if needs_mask:
            row_idx = (pl.program_id(0) * tile_m
                       + lax.broadcasted_iota(jnp.int32, (tile_m, 1), 0))
            valid = jnp.logical_and(valid, row_idx < n_valid)
        valid_f = valid.astype(jnp.float32)

        terms = jnp.maximum(pos_d - neg_d + margin, 0.0)               # (TM, 1)
        sum_ref[...] = jnp.sum(terms * valid_f, axis=0, keepdims=True)  # (1, 1)
        cnt_ref[...] = jnp.sum(valid_f, axis=0, keepdims=True)          # (1, 1)

    return kernel


def cross_camera_triplet_loss(features, old_features, labels,
                              margin=MARGIN, tile_m=None):
    """features, old_features: (N, D) f32 or bf16; labels: (N,) ints. Scalar loss."""
    n, d = features.shape
    assert old_features.shape == (n, d)
    assert features.dtype == old_features.dtype
    in_dtype = features.dtype

    # Anchor-row tile: multiple of 8 sublanes so the tiled BlockSpecs stay aligned.
    if tile_m is None:
        tile_m = 256 if n > 256 else n
    tile_m = max(1, min(int(tile_m), n))
    tile_m = ((tile_m + 7) // 8) * 8
    n_pad = ((n + tile_m - 1) // tile_m) * tile_m
    grid_m = n_pad // tile_m

    f = features
    o = old_features
    lab = labels.astype(jnp.int32)
    if n_pad != n:
        pad = n_pad - n
        f = jnp.pad(f, ((0, pad), (0, 0)))
        o = jnp.pad(o, ((0, pad), (0, 0)))
        lab = jnp.pad(lab, (0, pad), constant_values=-1)
    lab_col = lab.reshape(n_pad, 1)   # two layouts so the kernel never transposes
    lab_row = lab.reshape(1, n_pad)

    isz = jnp.dtype(in_dtype).itemsize
    vmem_need = (4 * n_pad * d * isz            # resident f / o (+ buffering slack)
                 + 2 * tile_m * d * isz          # streamed anchor tile
                 + 16 * tile_m * n_pad * 4       # (TM, Npad) intermediates
                 + n_pad * d * 4                 # osq
                 + 8 * tile_m * d * 4            # (TM, D) intermediates
                 + (4 << 20))
    vmem_limit = int(min(max(vmem_need, 32 << 20), 100 << 20))

    cost = pl.CostEstimate(
        flops=int(6 * n_pad * n_pad * d + 40 * n_pad * n_pad),
        transcendentals=int(2 * n_pad),
        bytes_accessed=int(3 * n_pad * d * isz + 8 * n_pad + 8 * grid_m),
    )

    kernel = _make_kernel(n, n_pad, tile_m, d, float(margin), in_dtype)

    sums, cnts = pl.pallas_call(
        kernel,
        grid=(grid_m,),
        in_specs=[
            pl.BlockSpec((tile_m, d), lambda i: (i, 0)),   # anchor rows (streamed)
            pl.BlockSpec((n_pad, d), lambda i: (0, 0)),    # full features (pos gather)
            pl.BlockSpec((n_pad, d), lambda i: (0, 0)),    # full old_features
            pl.BlockSpec((tile_m, 1), lambda i: (i, 0)),   # labels, column layout
            pl.BlockSpec((1, n_pad), lambda i: (0, 0)),    # labels, row layout
        ],
        out_specs=[
            pl.BlockSpec((None, 1, 1), lambda i: (i, 0, 0)),
            pl.BlockSpec((None, 1, 1), lambda i: (i, 0, 0)),
        ],
        out_shape=[
            jax.ShapeDtypeStruct((grid_m, 1, 1), jnp.float32),  # per-tile sum(terms)
            jax.ShapeDtypeStruct((grid_m, 1, 1), jnp.float32),  # per-tile count
        ],
        compiler_params=pltpu.CompilerParams(
            dimension_semantics=("parallel",),
            vmem_limit_bytes=vmem_limit,
        ),
        cost_estimate=cost,
    )(f, f, o, lab_col, lab_row)

    total = jnp.sum(sums)
    cnt = jnp.sum(cnts)
    return jnp.where(cnt > 0.0, total / jnp.maximum(cnt, 1.0), jnp.float32(0.0))


def _reference_loss(features, old_features, labels, margin=MARGIN):
    """Numpy mirror of the PyTorch forward (loop-based), for verification."""
    f = np.asarray(features, np.float32)
    o = np.asarray(old_features, np.float32)
    lab = np.asarray(labels)
    n = f.shape[0]
    dmat = np.sqrt(((f[:, None, :] - o[None, :, :]) ** 2).sum(-1))
    terms = []
    for i in range(n):
        pos_inds = np.where(lab == lab[i])[0]
        neg_inds = np.where(lab != lab[i])[0]
        if len(pos_inds) == 0 or len(neg_inds) == 0:
            continue
        pos_ind = pos_inds[np.argmax(dmat[i][pos_inds])]
        neg_ind = neg_inds[np.argmin(dmat[i][neg_inds])]
        pd = np.sqrt(((f[i] - f[pos_ind] + PAIRWISE_EPS) ** 2).sum())
        nd = np.sqrt(((f[i] - o[neg_ind] + PAIRWISE_EPS) ** 2).sum())
        terms.append(max(pd - nd + margin, 0.0))
    return np.float32(np.mean(terms)) if terms else np.float32(0.0)


if __name__ == "__main__":
    key = jax.random.PRNGKey(0)
    k1, k2, k3, k4 = jax.random.split(key, 4)

    # Case 1: original small config, single tile.
    n, dim = 8, 32
    feats = jax.random.normal(k1, (n, dim), dtype=jnp.float32)
    old = jax.random.normal(k2, (n, dim), dtype=jnp.float32)
    labels = jnp.array([0, 1, 0, 1, 2, 2, 0, 1], dtype=jnp.int32)
    loss = jax.block_until_ready(cross_camera_triplet_loss(feats, old, labels))
    ref = _reference_loss(feats, old, labels)
    assert np.allclose(np.asarray(loss), ref, rtol=1e-3, atol=1e-4), (loss, ref)

    # Case 2: row-tiled grid (2 tiles) with padded tail rows.
    n2 = 12
    feats2 = jax.random.normal(k3, (n2, dim), dtype=jnp.float32)
    old2 = jax.random.normal(k4, (n2, dim), dtype=jnp.float32)
    labels2 = jnp.array(np.arange(n2) % 3, dtype=jnp.int32)
    loss2 = jax.block_until_ready(
        cross_camera_triplet_loss(feats2, old2, labels2, tile_m=8))
    ref2 = _reference_loss(feats2, old2, labels2)
    assert np.allclose(np.asarray(loss2), ref2, rtol=1e-3, atol=1e-4), (loss2, ref2)

    # Case 3: no valid anchors (all labels equal) -> 0.0, matching the module.
    loss3 = jax.block_until_ready(
        cross_camera_triplet_loss(feats, old, jnp.zeros((n,), jnp.int32)))
    assert np.allclose(np.asarray(loss3), 0.0, atol=1e-6), loss3

    # Case 4: bf16 inputs are consumed natively (no wrapper-side f32 cast).
    _ = jax.block_until_ready(
        cross_camera_triplet_loss(feats.astype(jnp.bfloat16),
                                  old.astype(jnp.bfloat16), labels))

    print("KERNEL_OK")
</pallas_src>

<mosaic_0001>
module attributes {stable_mosaic.version = 11 : i64} {
  func.func @kernel(%arg0: i32, %arg1: memref<8x32xf32, #tpu.memory_space<vmem>>, %arg2: memref<8x32xf32, #tpu.memory_space<vmem>>, %arg3: memref<8x32xf32, #tpu.memory_space<vmem>>, %arg4: memref<8x1xi32, #tpu.memory_space<vmem>>, %arg5: memref<1x8xi32, #tpu.memory_space<vmem>>, %arg6: memref<1x1x1xf32, #tpu.memory_space<vmem>>, %arg7: memref<1x1x1xf32, #tpu.memory_space<vmem>>) attributes {dimension_semantics = [#tpu.dimension_semantics<parallel>], iteration_bounds = array<i64: 1>, scalar_prefetch = 0 : i64, scratch_operands = 0 : i64, tpu.core_type = #tpu.core_type<tc>, window_params = [{transform_indices = @transform_0, window_bounds = array<i64: 8, 32>}, {pipeline_mode = #tpu.pipeline_mode<synchronous>, transform_indices = @transform_1, window_bounds = array<i64: 8, 32>}, {pipeline_mode = #tpu.pipeline_mode<synchronous>, transform_indices = @transform_2, window_bounds = array<i64: 8, 32>}, {transform_indices = @transform_3, window_bounds = array<i64: 8, 1>}, {pipeline_mode = #tpu.pipeline_mode<synchronous>, transform_indices = @transform_4, window_bounds = array<i64: 1, 8>}, {transform_indices = @transform_5, window_bounds = array<i64: 1, 1, 1>}, {transform_indices = @transform_6, window_bounds = array<i64: 1, 1, 1>}]} {
    %c0 = arith.constant 0 : index
    %c0_0 = arith.constant 0 : index
    %0 = vector.load %arg1[%c0, %c0_0] : memref<8x32xf32, #tpu.memory_space<vmem>>, vector<8x32xf32>
    %c0_1 = arith.constant 0 : index
    %c0_2 = arith.constant 0 : index
    %1 = vector.load %arg4[%c0_1, %c0_2] : memref<8x1xi32, #tpu.memory_space<vmem>>, vector<8x1xi32>
    %c0_3 = arith.constant 0 : index
    %c0_4 = arith.constant 0 : index
    %2 = vector.load %arg5[%c0_3, %c0_4] : memref<1x8xi32, #tpu.memory_space<vmem>>, vector<1x8xi32>
    %c0_5 = arith.constant 0 : index
    %c0_6 = arith.constant 0 : index
    %3 = vector.load %arg3[%c0_5, %c0_6] : memref<8x32xf32, #tpu.memory_space<vmem>>, vector<8x32xf32>
    %cst = arith.constant dense<0.000000e+00> : vector<8x8xf32>
    %4 = tpu.matmul %0, %3, %cst {dimension_numbers = #tpu.dot_dimension_numbers<[1], [1], [0], [0], [0, 0, 1, 0], [], []>} : vector<8x32xf32>, vector<8x32xf32>, vector<8x8xf32> -> vector<8x8xf32>
    %5 = arith.mulf %0, %0 : vector<8x32xf32>
    %cst_7 = arith.constant dense<0.000000e+00> : vector<8xf32>
    %6 = vector.multi_reduction <add>, %5, %cst_7 [1] : vector<8x32xf32> to vector<8xf32>
    %7 = vector.shape_cast %6 : vector<8xf32> to vector<8x1xf32>
    %8 = arith.mulf %3, %3 : vector<8x32xf32>
    %cst_8 = arith.constant 1.000000e+00 : f32
    %9 = vector.broadcast %cst_8 : f32 to vector<1x32xf32>
    %cst_9 = arith.constant dense<0.000000e+00> : vector<1x8xf32>
    %10 = tpu.matmul %9, %8, %cst_9 {dimension_numbers = #tpu.dot_dimension_numbers<[1], [1], [0], [0], [0, 0, 1, 0], [], []>} : vector<1x32xf32>, vector<8x32xf32>, vector<1x8xf32> -> vector<1x8xf32>
    %cst_10 = arith.constant 2.000000e+00 : f32
    %11 = vector.broadcast %cst_10 : f32 to vector<8x8xf32>
    %12 = arith.mulf %11, %4 : vector<8x8xf32>
    %13 = vector.broadcast %7 : vector<8x1xf32> to vector<8x8xf32>
    %14 = arith.subf %13, %12 : vector<8x8xf32>
    %15 = vector.broadcast %10 : vector<1x8xf32> to vector<8x8xf32>
    %16 = arith.addf %14, %15 : vector<8x8xf32>
    %17 = tpu.iota {dimensions = array<i32: 1>} : vector<8x8xi32>
    %18 = vector.broadcast %1 : vector<8x1xi32> to vector<8x8xi32>
    %19 = vector.broadcast %2 : vector<1x8xi32> to vector<8x8xi32>
    %20 = arith.cmpi eq, %18, %19 : vector<8x8xi32>
    %cst_11 = arith.constant 0xFF800000 : f32
    %21 = vector.broadcast %cst_11 : f32 to vector<8x8xf32>
    %22 = arith.select %20, %16, %21 : vector<8x8xi1>, vector<8x8xf32>
    %cst_12 = arith.constant dense<0xFF800000> : vector<8xf32>
    %23 = vector.multi_reduction <maximumf>, %22, %cst_12 [1] : vector<8x8xf32> to vector<8xf32>
    %24 = vector.shape_cast %23 : vector<8xf32> to vector<8x1xf32>
    %25 = vector.broadcast %24 : vector<8x1xf32> to vector<8x8xf32>
    %26 = arith.cmpf oeq, %22, %25 : vector<8x8xf32>
    %c8_i32 = arith.constant 8 : i32
    %27 = vector.broadcast %c8_i32 : i32 to vector<8x8xi32>
    %28 = arith.select %26, %17, %27 : vector<8x8xi1>, vector<8x8xi32>
    %cst_13 = arith.constant dense<2147483647> : vector<8xi32>
    %29 = vector.multi_reduction <minsi>, %28, %cst_13 [1] : vector<8x8xi32> to vector<8xi32>
    %30 = vector.shape_cast %29 : vector<8xi32> to vector<8x1xi32>
    %31 = vector.broadcast %30 : vector<8x1xi32> to vector<8x8xi32>
    %32 = arith.cmpi eq, %17, %31 : vector<8x8xi32>
    %33 = arith.extui %32 : vector<8x8xi1> to vector<8x8xi32>
    %34 = arith.sitofp %33 : vector<8x8xi32> to vector<8x8xf32>
    %c0_14 = arith.constant 0 : index
    %c0_15 = arith.constant 0 : index
    %35 = vector.load %arg2[%c0_14, %c0_15] : memref<8x32xf32, #tpu.memory_space<vmem>>, vector<8x32xf32>
    %cst_16 = arith.constant dense<0.000000e+00> : vector<8x32xf32>
    %36 = tpu.matmul %34, %35, %cst_16 {dimension_numbers = #tpu.dot_dimension_numbers<[1], [0], [0], [1], [0, 0, 1, 1], [], []>} : vector<8x8xf32>, vector<8x32xf32>, vector<8x32xf32> -> vector<8x32xf32>
    %37 = arith.subf %0, %36 : vector<8x32xf32>
    %cst_17 = arith.constant 9.99999997E-7 : f32
    %38 = vector.broadcast %cst_17 : f32 to vector<8x32xf32>
    %39 = arith.addf %37, %38 : vector<8x32xf32>
    %40 = arith.mulf %39, %39 : vector<8x32xf32>
    %cst_18 = arith.constant dense<0.000000e+00> : vector<8xf32>
    %41 = vector.multi_reduction <add>, %40, %cst_18 [1] : vector<8x32xf32> to vector<8xf32>
    %42 = vector.shape_cast %41 : vector<8xf32> to vector<8x1xf32>
    %43 = math.sqrt %42 : vector<8x1xf32>
    %cst_19 = arith.constant 0x7F800000 : f32
    %44 = vector.broadcast %cst_19 : f32 to vector<8x8xf32>
    %45 = arith.select %20, %44, %16 : vector<8x8xi1>, vector<8x8xf32>
    %cst_20 = arith.constant dense<0x7F800000> : vector<8xf32>
    %46 = vector.multi_reduction <minimumf>, %45, %cst_20 [1] : vector<8x8xf32> to vector<8xf32>
    %47 = vector.shape_cast %46 : vector<8xf32> to vector<8x1xf32>
    %48 = vector.broadcast %47 : vector<8x1xf32> to vector<8x8xf32>
    %49 = arith.cmpf oeq, %45, %48 : vector<8x8xf32>
    %c8_i32_21 = arith.constant 8 : i32
    %50 = vector.broadcast %c8_i32_21 : i32 to vector<8x8xi32>
    %51 = arith.select %49, %17, %50 : vector<8x8xi1>, vector<8x8xi32>
    %cst_22 = arith.constant dense<2147483647> : vector<8xi32>
    %52 = vector.multi_reduction <minsi>, %51, %cst_22 [1] : vector<8x8xi32> to vector<8xi32>
    %53 = vector.shape_cast %52 : vector<8xi32> to vector<8x1xi32>
    %54 = vector.broadcast %53 : vector<8x1xi32> to vector<8x8xi32>
    %55 = arith.cmpi eq, %17, %54 : vector<8x8xi32>
    %56 = arith.extui %55 : vector<8x8xi1> to vector<8x8xi32>
    %57 = arith.sitofp %56 : vector<8x8xi32> to vector<8x8xf32>
    %cst_23 = arith.constant dense<0.000000e+00> : vector<8x32xf32>
    %58 = tpu.matmul %57, %3, %cst_23 {dimension_numbers = #tpu.dot_dimension_numbers<[1], [0], [0], [1], [0, 0, 1, 1], [], []>} : vector<8x8xf32>, vector<8x32xf32>, vector<8x32xf32> -> vector<8x32xf32>
    %59 = arith.subf %0, %58 : vector<8x32xf32>
    %cst_24 = arith.constant 9.99999997E-7 : f32
    %60 = vector.broadcast %cst_24 : f32 to vector<8x32xf32>
    %61 = arith.addf %59, %60 : vector<8x32xf32>
    %62 = arith.mulf %61, %61 : vector<8x32xf32>
    %cst_25 = arith.constant dense<0.000000e+00> : vector<8xf32>
    %63 = vector.multi_reduction <add>, %62, %cst_25 [1] : vector<8x32xf32> to vector<8xf32>
    %64 = vector.shape_cast %63 : vector<8xf32> to vector<8x1xf32>
    %65 = math.sqrt %64 : vector<8x1xf32>
    %66 = arith.extui %20 : vector<8x8xi1> to vector<8x8xi32>
    %67 = arith.sitofp %66 : vector<8x8xi32> to vector<8x8xf32>
    %cst_26 = arith.constant dense<0.000000e+00> : vector<8xf32>
    %68 = vector.multi_reduction <add>, %67, %cst_26 [1] : vector<8x8xf32> to vector<8xf32>
    %69 = vector.shape_cast %68 : vector<8xf32> to vector<8x1xf32>
    %cst_27 = arith.constant 8.000000e+00 : f32
    %70 = vector.broadcast %cst_27 : f32 to vector<8x1xf32>
    %71 = arith.cmpf olt, %69, %70 : vector<8x1xf32>
    %72 = arith.extui %71 : vector<8x1xi1> to vector<8x1xi32>
    %73 = arith.sitofp %72 : vector<8x1xi32> to vector<8x1xf32>
    %74 = arith.subf %43, %65 : vector<8x1xf32>
    %cst_28 = arith.constant 2.000000e-01 : f32
    %75 = vector.broadcast %cst_28 : f32 to vector<8x1xf32>
    %76 = arith.addf %74, %75 : vector<8x1xf32>
    %cst_29 = arith.constant 0.000000e+00 : f32
    %77 = vector.broadcast %cst_29 : f32 to vector<8x1xf32>
    %78 = arith.maximumf %76, %77 : vector<8x1xf32>
    %79 = arith.mulf %78, %73 : vector<8x1xf32>
    %cst_30 = arith.constant dense<0.000000e+00> : vector<1xf32>
    %80 = vector.multi_reduction <add>, %79, %cst_30 [0] : vector<8x1xf32> to vector<1xf32>
    %81 = vector.shape_cast %80 : vector<1xf32> to vector<1x1xf32>
    %c0_31 = arith.constant 0 : index
    %c0_32 = arith.constant 0 : index
    %c0_33 = arith.constant 0 : index
    %82 = vector.load %arg6[%c0_31, %c0_32, %c0_33] : memref<1x1x1xf32, #tpu.memory_space<vmem>>, vector<1x1x1xf32>
    %83 = vector.shape_cast %82 : vector<1x1x1xf32> to vector<1x1xf32>
    %84 = vector.shape_cast %81 : vector<1x1xf32> to vector<1x1x1xf32>
    tpu.vector_store %arg6[%c0_31, %c0_32, %c0_33], %84 {strides = array<i32>} : memref<1x1x1xf32, #tpu.memory_space<vmem>>, vector<1x1x1xf32>,
    %cst_34 = arith.constant dense<0.000000e+00> : vector<1xf32>
    %85 = vector.multi_reduction <add>, %73, %cst_34 [0] : vector<8x1xf32> to vector<1xf32>
    %86 = vector.shape_cast %85 : vector<1xf32> to vector<1x1xf32>
    %c0_35 = arith.constant 0 : index
    %c0_36 = arith.constant 0 : index
    %c0_37 = arith.constant 0 : index
    %87 = vector.load %arg7[%c0_35, %c0_36, %c0_37] : memref<1x1x1xf32, #tpu.memory_space<vmem>>, vector<1x1x1xf32>
    %88 = vector.shape_cast %87 : vector<1x1x1xf32> to vector<1x1xf32>
    %89 = vector.shape_cast %86 : vector<1x1xf32> to vector<1x1x1xf32>
    tpu.vector_store %arg7[%c0_35, %c0_36, %c0_37], %89 {strides = array<i32>} : memref<1x1x1xf32, #tpu.memory_space<vmem>>, vector<1x1x1xf32>,
    return
  }
  func.func @transform_0(%arg0: i32) -> (i32, i32) {
    %c0_i32 = arith.constant 0 : i32
    %c0_i32_0 = arith.constant 0 : i32
    return %arg0, %c0_i32 : i32, i32
  }
  func.func @transform_1(%arg0: i32) -> (i32, i32) {
    %c0_i32 = arith.constant 0 : i32
    %c0_i32_0 = arith.constant 0 : i32
    %c0_i32_1 = arith.constant 0 : i32
    return %c0_i32, %c0_i32_0 : i32, i32
  }
  func.func @transform_2(%arg0: i32) -> (i32, i32) {
    %c0_i32 = arith.constant 0 : i32
    %c0_i32_0 = arith.constant 0 : i32
    %c0_i32_1 = arith.constant 0 : i32
    return %c0_i32, %c0_i32_0 : i32, i32
  }
  func.func @transform_3(%arg0: i32) -> (i32, i32) {
    %c0_i32 = arith.constant 0 : i32
    %c0_i32_0 = arith.constant 0 : i32
    return %arg0, %c0_i32 : i32, i32
  }
  func.func @transform_4(%arg0: i32) -> (i32, i32) {
    %c0_i32 = arith.constant 0 : i32
    %c0_i32_0 = arith.constant 0 : i32
    %c0_i32_1 = arith.constant 0 : i32
    return %c0_i32, %c0_i32_0 : i32, i32
  }
  func.func @transform_5(%arg0: i32) -> (i32, i32, i32) {
    %c0_i32 = arith.constant 0 : i32
    %c0_i32_0 = arith.constant 0 : i32
    %c0_i32_1 = arith.constant 0 : i32
    return %arg0, %c0_i32, %c0_i32_0 : i32, i32, i32
  }
  func.func @transform_6(%arg0: i32) -> (i32, i32, i32) {
    %c0_i32 = arith.constant 0 : i32
    %c0_i32_0 = arith.constant 0 : i32
    %c0_i32_1 = arith.constant 0 : i32
    return %arg0, %c0_i32, %c0_i32_0 : i32, i32, i32
  }
}

</mosaic_0001>

<bundles_post_ra>
// kernel: tpu_custom_call.1
= control target key start
LH: loop header
LB: loop body
LE: loop exit
PB: predicated region body
PF: predicated region fallthrough
CT: control target
= control target key end

     0   :  { %12 = vsyncpa [#allocation3], 0  ;;  %s546_s0 = inlined_call_operand.vmem [shape: f32[8,32], index: 0, kind: input, shape index: {}]   ;;  %s547_s1 = inlined_call_operand.hbm [shape: f32[8,32], index: 1, kind: input, shape index: {}]   ;;  %s548_s2 = inlined_call_operand.hbm [shape: f32[8,32], index: 2, kind: input, shape index: {}]   ;;  %s549_s3 = inlined_call_operand.vmem [shape: s32[8,1], index: 3, kind: input, shape index: {}]   ;;  %s550_s4 = inlined_call_operand.vmem [shape: s32[1,8], index: 4, kind: input, shape index: {}]   ;;  %s551_s5 = inlined_call_operand.hbm [shape: f32[1,1,1], index: 5, kind: output, shape index: {0}]   ;;  %s552_s6 = inlined_call_operand.hbm [shape: f32[1,1,1], index: 6, kind: output, shape index: {1}]  }
   0x1   :  { %13 = vsyncpa [#allocation6], 0 }
   0x2   :  { %14 = vsyncpa [#allocation4], 0 }
   0x3   :  { %15 = vsyncpa [#allocation9], 0  ;;  %s23_s23 = sshll.u32 %s547_s1, 4  ;;  %s445_s24 = smov [#allocation2]   ;;  %s24_s23 = int_to_ptr.hbm [resolvable:$true] %s23_s23 }
   0x4   :  { %s25_s25 = sshll.u32 %s445_s24, 4  ;;  %s34_s28 = sshll.u32 %s548_s2, 4  ;;  %s26_s25 = int_to_ptr.vmem [resolvable:$true] %s25_s25  ;;  %s35_s28 = int_to_ptr.hbm [resolvable:$true] %s34_s28 }
   0x5   :  { %28 = dma.hbm_to_vmem [thread:$0]  %s24_s23, 128, %s26_s25, [#allocation3]  }
   0x6   :  { %s446_s29 = smov [#allocation5]  }
   0x7   :  { %s36_s30 = sshll.u32 %s446_s29, 4  ;;  %s37_s30 = int_to_ptr.vmem [resolvable:$true] %s36_s30 }
   0x8   :  { %39 = dma.hbm_to_vmem [thread:$0]  %s35_s28, 128, %s37_s30, [#allocation6]  }
   0x9   :  { %437 = dma.done.wait [#allocation3], 128  }
   0xa   :  { %438 = vsyncadd [#allocation3], 4294967168 }
   0xb   :  { %439 = dma.done.wait [#allocation6], 128  }
   0xc   :  { %440 = vsyncadd [#allocation6], 4294967168  ;;  %v447_v0 = vmov 0   ;;  %vm56_vm0 = vcmask 261120   ;;  %v55_v1 = vld [vmem:[#allocation5] sm:$0xff]  ;;  %v496_v2 = vld [vmem:[%s546_s0] sm:$0xff]  ;;  %v118_v21 = vlaneseq }
   0xd   :  { %335 = vset.pattern.permute.xlu0 %v447_v0  ;;  %318 = vmatpush.xpose.msk.msra.mxu0 %vm56_vm0, %v55_v1  ;;  %v87_v3 = vmul.f32 %v55_v1, %v55_v1  ;;  %v83_v4 = vmul.f32 %v496_v2, %v496_v2  ;;  %v448_v6 = vmov 1.0   ;;  %v53_v7 = vld [vmem:[%s549_s3] sm:$0xff]  ;;  %vm126_vm1 = vcmask 64512   ;;  %s450_s3 = smov [#allocation8]   ;;  %s302_s12 = sshll.u32 %s552_s6, 4  ;;  %s303_s12 = int_to_ptr.hbm [resolvable:$true] %s302_s12 }
   0xe   :  { %234 = vmatpush.msra.mxu3 %v55_v1  ;;  %v512_v14 = vld [vmem:[%s550_s4] ss:$0 sm:$0xff]  ;;  %v119_v22 = vand.u32 127, %v118_v21  ;;  %v449_v48 = vmov 0.0   ;;  %s300_s4 = sshll.u32 %s450_s3, 4  ;;  %vm275_vm10 = vcmask 0   ;;  %s301_s4 = int_to_ptr.vmem [resolvable:$true] %s300_s4 }
   0xf   :  { %320 = vmatpush.xpose.msk.msra.mxu1 %vm56_vm0, %v87_v3  ;;  %v84_v5 = vsel %vm56_vm0, %v83_v4, 0.0  ;;  %v150_v41 = vld [vmem:[#allocation2] sm:$0xff]  ;;  %s451_s6 = smov [#allocation7]   ;;  %s291_s16 = sshll.u32 %s551_s5, 4  ;;  %s292_s16 = int_to_ptr.hbm [resolvable:$true] %s291_s16 }
  0x10   :  { %85 = vadd.xlane.f32.xlu0 %v84_v5  ;;  %319 = vmatmul.msk.f32.vlgmr.msra.gmra.mxu0 %vm56_vm0, %v496_v2  ;;  %s289_s13 = sshll.u32 %s451_s6, 4  ;;  %s290_s13 = int_to_ptr.vmem [resolvable:$true] %s289_s13 }
  0x11   :  { %169 = vmatpush.msra.mxu2 %v150_v41 }
  0x12   :  { %321 = vmatmul.msk.f32.vlgmr.msra.gmra.mxu1 %vm56_vm0, %v448_v6 }
  0x24   :  { %121 = vperm.xlu0 %335, %v53_v7  }
  0x83   :  { %v86_v9 = vpop.xlane.xlu0 %85 }
  0x8d   :  { %v80_v8 = vpop.f32.mrf.mxu0 }
  0x8e   :  { %v114_v10 = vmul.f32 2.0, %v80_v8 }
  0x8f   :  { %v111_v11 = vpop.f32.mrf.mxu1 }
  0x90   :  { %v115_v12 = vsub.f32 %v86_v9, %v114_v10  ;;  %v116_v13 = vperm.slane %v111_v11, 0 }
  0x92   :  { %v117_v15 = vadd.f32 %v116_v13, %v115_v12 }
  0x96   :  { %v514_v16 = vpop.permute.xlu0 %121 }
  0x97   :  { %vm124_vm2 = vcmp.eq.s32.totalorder %v514_v16, %v512_v14 }
  0x98   :  { %v125_v17 = vsel %vm124_vm2, %v117_v15, -inf  ;;  %v192_v19 = vsel %vm124_vm2, inf, %v117_v15  ;;  %v326_v63 = vsel %vm124_vm2, 1.0, %v449_v48 }
  0x99   :  { %v127_v18 = vsel %vm126_vm1, %v125_v17, -inf  ;;  %v193_v20 = vsel %vm126_vm1, %v192_v19, inf  ;;  %v259_v3 = vsel %vm126_vm1, %v326_v63, 0.0 }
  0x9a   :  { %128 = vmax.xlane.f32.xlu1 %v127_v18 }
  0xa2   :  { %194 = vmin.xlane.f32.xlu1 %v193_v20 }
 0x10d   :  { %v129_v23 = vpop.xlane.xlu1 %128 }
 0x10e   :  { %vm130_vm3 = vcmp.eq.f32.partialorder %v125_v17, %v129_v23 }
 0x10f   :  { %v131_v24 = vsel %vm130_vm3, %v119_v22, 8 }
 0x110   :  { %v132_v25 = vsel %vm126_vm1, %v131_v24, 2147483647 }
 0x111   :  { %v134_v26 = vshra.s32 %v132_v25, 16  ;;  %v133_v33 = vand.u32 65535, %v132_v25 }
 0x113   :  { %v136_v27 = vcvt.s32.f32 %v134_v26  ;;  %v135_v35 = vcvt.s32.f32 %v133_v33 }
 0x115   :  { %137 = vmin.xlane.f32.xlu2 %v136_v27  ;;  %v195_v28 = vpop.xlane.xlu1 %194 }
 0x116   :  { %vm196_vm4 = vcmp.eq.f32.partialorder %v192_v19, %v195_v28 }
 0x117   :  { %v197_v29 = vsel %vm196_vm4, %v119_v22, 8 }
 0x118   :  { %v198_v30 = vsel %vm126_vm1, %v197_v29, 2147483647 }
 0x119   :  { %v200_v31 = vshra.s32 %v198_v30, 16  ;;  %v199_v37 = vand.u32 65535, %v198_v30 }
 0x11b   :  { %v202_v32 = vcvt.s32.f32 %v200_v31  ;;  %v201_v39 = vcvt.s32.f32 %v199_v37 }
 0x11d   :  { %203 = vmin.xlane.f32.xlu2 %v202_v32 }
 0x188   :  { %v138_v34 = vpop.xlane.xlu2 %137 }
 0x189   :  { %vm139_vm5 = vcmp.eq.f32.partialorder %v136_v27, %v138_v34  ;;  %v144_v42 = vcvt.f32.s32 %v138_v34 }
 0x18a   :  { %v140_v36 = vsel %vm139_vm5, %v135_v35, inf }
 0x18b   :  { %141 = vmin.xlane.f32.xlu1 %v140_v36  ;;  %v145_v44 = vshll.u32 %v144_v42, 16 }
 0x190   :  { %v204_v38 = vpop.xlane.xlu2 %203 }
 0x191   :  { %vm205_vm6 = vcmp.eq.f32.partialorder %v202_v32, %v204_v38  ;;  %v210_v47 = vcvt.f32.s32 %v204_v38 }
 0x192   :  { %v206_v40 = vsel %vm205_vm6, %v201_v39, inf }
 0x193   :  { %207 = vmin.xlane.f32.xlu2 %v206_v40  ;;  %v211_v51 = vshll.u32 %v210_v47, 16 }
 0x1fe   :  { %v142_v43 = vpop.xlane.xlu1 %141 }
 0x1ff   :  { %v143_v45 = vcvt.f32.s32 %v142_v43 }
 0x201   :  { %v146_v46 = vadd.s32 %v145_v44, %v143_v45 }
 0x203   :  { %vm147_vm7 = vcmp.eq.s32.totalorder %v119_v22, %v146_v46 }
 0x204   :  { %v322_v49 = vsel %vm147_vm7, 1.0, %v449_v48 }
 0x205   :  { %323 = vmatmul.msk.f32.vlgmr.msra.gmra.mxu2 %vm126_vm1, %v322_v49 }
 0x206   :  { %v208_v50 = vpop.xlane.xlu2 %207 }
 0x207   :  { %v209_v52 = vcvt.f32.s32 %v208_v50 }
 0x209   :  { %v212_v53 = vadd.s32 %v211_v51, %v209_v52 }
 0x20b   :  { %vm213_vm8 = vcmp.eq.s32.totalorder %v119_v22, %v212_v53 }
 0x20c   :  { %v324_v54 = vsel %vm213_vm8, 1.0, %v449_v48 }
 0x20d   :  { %325 = vmatmul.msk.f32.vlgmr.msra.gmra.mxu3 %vm126_vm1, %v324_v54 }
 0x288   :  { %v171_v55 = vpop.f32.mrf.mxu2 }
 0x289   :  { %v174_v56 = vsub.f32 %v496_v2, %v171_v55 }
 0x28b   :  { %v175_v57 = vadd.f32 1e-06, %v174_v56 }
 0x28d   :  { %v176_v58 = vmul.f32 %v175_v57, %v175_v57 }
 0x28f   :  { %v177_v59 = vsel %vm56_vm0, %v176_v58, 0.0 }
 0x290   :  { %v236_v60 = vpop.f32.mrf.mxu3  ;;  %178 = vadd.xlane.f32.xlu1 %v177_v59 }
 0x291   :  { %v239_v61 = vsub.f32 %v496_v2, %v236_v60 }
 0x293   :  { %v240_v62 = vadd.f32 1e-06, %v239_v61 }
 0x295   :  { %v241_v0 = vmul.f32 %v240_v62, %v240_v62 }
 0x297   :  { %v242_v1 = vsel %vm56_vm0, %v241_v0, 0.0 }
 0x298   :  { %243 = vadd.xlane.f32.xlu2 %v242_v1  ;;  %260 = vadd.xlane.f32.xlu1 %v259_v3 }
 0x303   :  { %v179_v4 = vpop.xlane.xlu1 %178 }
 0x304   :  { %337 = vrsqrt.f32 %v179_v4  ;;  %vm187_vm11 = vcmp.eq.f32.partialorder %v179_v4, inf  ;;  %v190_v28 = vand.u32 2147483648, %v179_v4  ;;  %vm189_vm13 = vcmp.eq.f32.partialorder %v179_v4, 0.0 }
 0x30a   :  { %v338_v5 = vpop.eup %337 }
 0x30b   :  { %v181_v6 = vmul.f32 %v338_v5, %v179_v4  ;;  %v244_v7 = vpop.xlane.xlu2 %243  ;;  %v261_v8 = vpop.xlane.xlu1 %260 }
 0x30c   :  { %339 = vrsqrt.f32 %v244_v7  ;;  %vm262_vm9 = vcmp.lt.f32.partialorder %v261_v8, 8.0  ;;  %vm252_vm12 = vcmp.eq.f32.partialorder %v244_v7, inf  ;;  %v255_v29 = vand.u32 2147483648, %v244_v7 }
 0x30d   :  { %v182_v2 = vmul.f32 %v338_v5, %v181_v6  ;;  %v327_v9 = vsel %vm262_vm9, 1.0, %v449_v48  ;;  %vm254_vm14 = vcmp.eq.f32.partialorder %v244_v7, 0.0 }
 0x30e   :  { %v277_v11 = vrot.slane %v327_v9, 4 }
 0x30f   :  { %v183_v10 = vmul.f32 0.5, %v182_v2 }
 0x310   :  { %v278_v13 = vadd.f32 %v327_v9, %v277_v11 }
 0x311   :  { %v184_v12 = vsub.f32 1.5, %v183_v10 }
 0x312   :  { %v340_v14 = vpop.eup %339  ;;  %v279_v16 = vrot.slane %v278_v13, 2 }
 0x313   :  { %v246_v15 = vmul.f32 %v340_v14, %v244_v7  ;;  %v185_v18 = vmul.f32 %v338_v5, %v184_v12 }
 0x314   :  { %v280_v19 = vadd.f32 %v279_v16, %v278_v13 }
 0x315   :  { %v247_v17 = vmul.f32 %v340_v14, %v246_v15  ;;  %v186_v23 = vmul.f32 %v185_v18, %v179_v4 }
 0x316   :  { %v281_v21 = vrot.slane %v280_v19, 1 }
 0x317   :  { %v248_v20 = vmul.f32 0.5, %v247_v17  ;;  %v188_v27 = vsel %vm187_vm11, %v179_v4, %v186_v23 }
 0x318   :  { %v282_v24 = vadd.f32 %v281_v21, %v280_v19  ;;  %v191_v31 = vsel %vm189_vm13, %v190_v28, %v188_v27 }
 0x319   :  { %v249_v22 = vsub.f32 1.5, %v248_v20 }
 0x31a   :  { %283 = vst.msk [vmem:[#allocation8] sm:$0x1] %vm275_vm10, %v282_v24 }
 0x31b   :  { %v250_v25 = vmul.f32 %v340_v14, %v249_v22  ;;  %305 = dma.vmem_to_hbm [thread:$0]  %s301_s4, 16, %s303_s12, [#allocation9]  }
 0x31d   :  { %v251_v26 = vmul.f32 %v250_v25, %v244_v7 }
 0x31f   :  { %v253_v30 = vsel %vm252_vm12, %v244_v7, %v251_v26 }
 0x320   :  { %v256_v32 = vsel %vm254_vm14, %v255_v29, %v253_v30 }
 0x321   :  { %v265_v33 = vsub.f32 %v191_v31, %v256_v32 }
 0x323   :  { %v266_v34 = vadd.f32 0.2, %v265_v33 }
 0x325   :  { %v267_v35 = vmax.f32 %v266_v34, 0.0 }
 0x327   :  { %v268_v36 = vmul.f32 %v327_v9, %v267_v35 }
 0x329   :  { %v269_v37 = vrot.slane %v268_v36, 4 }
 0x32b   :  { %v270_v38 = vadd.f32 %v269_v37, %v268_v36 }
 0x32d   :  { %v271_v39 = vrot.slane %v270_v38, 2 }
 0x32f   :  { %v272_v40 = vadd.f32 %v271_v39, %v270_v38 }
 0x331   :  { %v273_v41 = vrot.slane %v272_v40, 1 }
 0x333   :  { %v274_v42 = vadd.f32 %v273_v41, %v272_v40 }
 0x335   :  { %276 = vst.msk [vmem:[#allocation7] sm:$0x1] %vm275_vm10, %v274_v42 }
 0x336   :  { %294 = dma.vmem_to_hbm [thread:$0]  %s290_s13, 16, %s292_s16, [#allocation4]  }
 0x337   :  { %441 = dma.done.wait [#allocation4], 16  }
 0x338   :  { %442 = vsyncadd [#allocation4], 4294967280 }
 0x339   :  { %443 = dma.done.wait [#allocation9], 16  }
 0x33a   :  { %444 = vsyncadd [#allocation9], 4294967280 }
 0x33b   :  { %314 = vsyncpa [#allocation3], 1 }
 0x33c   :  { %315 = vsyncpa [#allocation6], 1 }
 0x33d   :  { %316 = vsyncpa [#allocation4], 1 }
 0x33e   :  { %317 = vsyncpa [#allocation9], 1 }

</bundles_post_ra>
